<compile_context>
chip_gen: v7x
topology: tpu7x:2x2x1
jax: 0.10.0
libtpu: 0.0.40
codegen_flags: <defaults>
</compile_context>

<pallas_src>
import jax
import jax.numpy as jnp
from jax.experimental import pallas as pl
from jax.experimental.pallas import tpu as pltpu

_LANES = 128

# Cephes-style single-precision asin polynomial coefficients
# (argument z = x*x for |x| <= 0.5, z = (1-|x|)/2 otherwise).
_P0 = 1.6666752422e-1
_P1 = 7.4953002686e-2
_P2 = 4.5470025998e-2
_P3 = 2.4181311049e-2
_P4 = 4.2163199048e-2
_HALF_PI = 1.5707963267948966


def _asin_f32(x):
    """Branchless float32 arcsine (Cephes asinf), ~2.5e-7 peak rel. error.

    Only transcendental is a sqrt (EUP slot).  |x| > 1 -> NaN via
    sqrt(negative), matching torch.asin; NaN inputs propagate.
    """
    a = jnp.abs(x)
    big = a > 0.5
    z = jnp.where(big, 0.5 * (1.0 - a), a * a)
    s = jnp.sqrt(z)                      # EUP path; NaN when |x| > 1
    t = jnp.where(big, s, a)
    p = ((((_P4 * z + _P3) * z + _P2) * z + _P1) * z + _P0) * z * t + t
    r = jnp.where(big, _HALF_PI - (p + p), p)
    return jnp.where(x < 0, -r, r)


def _asin_kernel(x_ref, o_ref):
    # Upcast narrow dtypes in-kernel so HBM/VMEM traffic stays narrow
    # (mem-bound on v5e) while the math runs at f32 accuracy.
    x = x_ref[...].astype(jnp.float32)
    o_ref[...] = _asin_f32(x).astype(o_ref.dtype)


def _round_up(v, m):
    return ((v + m - 1) // m) * m


def _tensorcores_per_chip() -> int:
    """Best-effort TensorCore-per-chip count (2 on v7x, else 1)."""
    try:
        kind = jax.devices()[0].device_kind.lower()
        if "v7" in kind or "7x" in kind:
            return 2
    except Exception:
        pass
    try:
        info = pltpu.get_tpu_info()
        for attr in ("num_cores", "core_count", "num_tensorcores",
                     "tensorcores_per_chip"):
            v = getattr(info, attr, None)
            if isinstance(v, int) and v > 1:
                return v
    except Exception:
        pass
    return 1


def asin_pallas(x: jax.Array, *, tile_rows: int = 2048) -> jax.Array:
    """Elementwise asin(x) with a Pallas TPU kernel (torch.asin semantics)."""
    # TODO(synk): integer inputs would need torch-style promotion to float;
    # this wrapper assumes floating-point inputs.
    orig_shape = x.shape
    dtype = x.dtype
    n = x.size

    if n == 0:
        # Empty tensor: nothing to launch.
        return jnp.reshape(x, orig_shape)

    itemsize = jnp.dtype(dtype).itemsize
    sublane = max(8, 32 // max(itemsize, 1))   # 8 (f32) / 16 (bf16,f16) / 32 (8-bit)

    flat = jnp.ravel(x)                        # contiguous: free
    n_main = (n // _LANES) * _LANES            # largest lane-aligned prefix

    def tail_asin(t):
        return _asin_f32(t.astype(jnp.float32)).astype(dtype)

    if n_main == 0:
        # Fewer than 128 elements: a kernel launch is pure overhead.
        return tail_asin(flat).reshape(orig_shape)

    rows = n_main // _LANES

    # ---- tile selection ----------------------------------------------------
    tile_rows_eff = min(tile_rows, rows)
    if _tensorcores_per_chip() > 1:
        # v7x (2 TCs): aim for >= ~8 grid steps so each core pipelines several
        # double-buffered blocks, but keep blocks >= 512 rows (~roofline-saturating).
        target = max(512, _round_up(pl.cdiv(rows, 8), sublane))
        tile_rows_eff = min(tile_rows_eff, target)
    if tile_rows_eff < rows:
        # Blocks that do not span all rows must be sublane-aligned.
        tile_rows_eff = min(rows, max(sublane, _round_up(tile_rows_eff, sublane)))

    grid = (pl.cdiv(rows, tile_rows_eff),)

    slab = (flat if n_main == n else flat[:n_main]).reshape(rows, _LANES)

    out_slab = pl.pallas_call(
        _asin_kernel,
        out_shape=jax.ShapeDtypeStruct((rows, _LANES), dtype),
        grid_spec=pltpu.PrefetchScalarGridSpec(
            num_scalar_prefetch=0,
            grid=grid,
            in_specs=[pl.BlockSpec((tile_rows_eff, _LANES), lambda i: (i, 0))],
            out_specs=pl.BlockSpec((tile_rows_eff, _LANES), lambda i: (i, 0)),
        ),
        compiler_params=pltpu.CompilerParams(
            dimension_semantics=("parallel",),
        ),
    )(slab)

    if n_main == n:
        # Contiguous reshape back to the original shape: no extra HBM pass.
        return out_slab.reshape(orig_shape)

    # Ragged tail (< 128 elements): trivial wrapper-side compute; avoids the
    # old full-array pad + post-slice HBM passes.
    tail = tail_asin(flat[n_main:])
    return jnp.concatenate([out_slab.reshape(-1), tail]).reshape(orig_shape)


if __name__ == "__main__":
    key = jax.random.PRNGKey(0)
    # asin domain is [-1, 1]; draw uniformly inside it.
    x = jax.random.uniform(
        key, (2, 4, 16, 16), dtype=jnp.float32, minval=-0.99, maxval=0.99
    )

    y = asin_pallas(x)
    jax.block_until_ready(y)

    y_ref = jnp.arcsin(x)
    assert y.shape == x.shape and y.dtype == x.dtype
    # Both the kernel (Cephes asinf) and jnp.arcsin are f32 approximations of
    # the true arcsine to within a few ulp; allow a small absolute slack.
    assert jnp.allclose(y, y_ref, atol=2e-6, rtol=2e-6)

    print("KERNEL_OK")
</pallas_src>

<mosaic_0001>
module attributes {stable_mosaic.version = 11 : i64} {
  func.func @_asin_kernel(%arg0: i32, %arg1: memref<16x128xf32, #tpu.memory_space<vmem>>, %arg2: memref<16x128xf32, #tpu.memory_space<vmem>>) attributes {dimension_semantics = [#tpu.dimension_semantics<parallel>], iteration_bounds = array<i64: 1>, scalar_prefetch = 0 : i64, scratch_operands = 0 : i64, tpu.core_type = #tpu.core_type<tc>, window_params = [{transform_indices = @transform_0, window_bounds = array<i64: 16, 128>}, {transform_indices = @transform_1, window_bounds = array<i64: 16, 128>}]} {
    %c0 = arith.constant 0 : index
    %c0_0 = arith.constant 0 : index
    %0 = vector.load %arg1[%c0, %c0_0] : memref<16x128xf32, #tpu.memory_space<vmem>>, vector<16x128xf32>
    %1 = math.absf %0 : vector<16x128xf32>
    %cst = arith.constant 5.000000e-01 : f32
    %2 = vector.broadcast %cst : f32 to vector<16x128xf32>
    %3 = arith.cmpf ogt, %1, %2 : vector<16x128xf32>
    %cst_1 = arith.constant 1.000000e+00 : f32
    %4 = vector.broadcast %cst_1 : f32 to vector<16x128xf32>
    %5 = arith.subf %4, %1 : vector<16x128xf32>
    %cst_2 = arith.constant 5.000000e-01 : f32
    %6 = vector.broadcast %cst_2 : f32 to vector<16x128xf32>
    %7 = arith.mulf %6, %5 : vector<16x128xf32>
    %8 = arith.mulf %1, %1 : vector<16x128xf32>
    %9 = arith.select %3, %7, %8 : vector<16x128xi1>, vector<16x128xf32>
    %10 = math.sqrt %9 : vector<16x128xf32>
    %11 = arith.select %3, %10, %1 : vector<16x128xi1>, vector<16x128xf32>
    %cst_3 = arith.constant 4.216320e-02 : f32
    %12 = vector.broadcast %cst_3 : f32 to vector<16x128xf32>
    %13 = arith.mulf %12, %9 : vector<16x128xf32>
    %cst_4 = arith.constant 0.024181312 : f32
    %14 = vector.broadcast %cst_4 : f32 to vector<16x128xf32>
    %15 = arith.addf %13, %14 : vector<16x128xf32>
    %16 = arith.mulf %15, %9 : vector<16x128xf32>
    %cst_5 = arith.constant 0.0454700254 : f32
    %17 = vector.broadcast %cst_5 : f32 to vector<16x128xf32>
    %18 = arith.addf %16, %17 : vector<16x128xf32>
    %19 = arith.mulf %18, %9 : vector<16x128xf32>
    %cst_6 = arith.constant 0.0749530047 : f32
    %20 = vector.broadcast %cst_6 : f32 to vector<16x128xf32>
    %21 = arith.addf %19, %20 : vector<16x128xf32>
    %22 = arith.mulf %21, %9 : vector<16x128xf32>
    %cst_7 = arith.constant 0.166667521 : f32
    %23 = vector.broadcast %cst_7 : f32 to vector<16x128xf32>
    %24 = arith.addf %22, %23 : vector<16x128xf32>
    %25 = arith.mulf %24, %9 : vector<16x128xf32>
    %26 = arith.mulf %25, %11 : vector<16x128xf32>
    %27 = arith.addf %26, %11 : vector<16x128xf32>
    %28 = arith.addf %27, %27 : vector<16x128xf32>
    %cst_8 = arith.constant 1.57079637 : f32
    %29 = vector.broadcast %cst_8 : f32 to vector<16x128xf32>
    %30 = arith.subf %29, %28 : vector<16x128xf32>
    %31 = arith.select %3, %30, %27 : vector<16x128xi1>, vector<16x128xf32>
    %cst_9 = arith.constant 0.000000e+00 : f32
    %32 = vector.broadcast %cst_9 : f32 to vector<16x128xf32>
    %33 = arith.cmpf olt, %0, %32 : vector<16x128xf32>
    %cst_10 = arith.constant 0.000000e+00 : f32
    %34 = vector.broadcast %cst_10 : f32 to vector<16x128xf32>
    %35 = arith.subf %34, %31 : vector<16x128xf32>
    %36 = arith.select %33, %35, %31 : vector<16x128xi1>, vector<16x128xf32>
    %c0_11 = arith.constant 0 : index
    %c0_12 = arith.constant 0 : index
    %37 = vector.load %arg2[%c0_11, %c0_12] : memref<16x128xf32, #tpu.memory_space<vmem>>, vector<16x128xf32>
    tpu.vector_store %arg2[%c0_11, %c0_12], %36 {strides = array<i32>} : memref<16x128xf32, #tpu.memory_space<vmem>>, vector<16x128xf32>,
    return
  }
  func.func @transform_0(%arg0: i32) -> (i32, i32) {
    %c0_i32 = arith.constant 0 : i32
    %c0_i32_0 = arith.constant 0 : i32
    return %arg0, %c0_i32 : i32, i32
  }
  func.func @transform_1(%arg0: i32) -> (i32, i32) {
    %c0_i32 = arith.constant 0 : i32
    %c0_i32_0 = arith.constant 0 : i32
    return %arg0, %c0_i32 : i32, i32
  }
}

</mosaic_0001>

<bundles_post_ra>
// kernel: tpu_custom_call.1
= control target key start
LH: loop header
LB: loop body
LE: loop exit
PB: predicated region body
PF: predicated region fallthrough
CT: control target
= control target key end

     0   :  { %6 = vsyncpa [#allocation3], 0  ;;  %s220_s0 = inlined_call_operand.hbm [shape: f32[16,128], index: 0, kind: input, shape index: {}]   ;;  %s221_s1 = inlined_call_operand.hbm [shape: f32[16,128], index: 1, kind: output, shape index: {}]  }
   0x1   :  { %7 = vsyncpa [#allocation4], 0  ;;  %s162_s6 = smov [#allocation2]   ;;  %s114_s10 = scalar_lea.hbm %s220_s0, 256 }
   0x2   :  { %s13_s7 = sshll.u32 %s162_s6, 4  ;;  %p115_p0 = scmp.ne.s32.totalorder %s220_s0, %s114_s10  ;;  %s14_s7 = int_to_ptr.vmem [resolvable:$true] %s13_s7 }
   0x3   :  { %p118_p1 = scmp.lt.u32.totalorder %s114_s10, %s220_s0 }
   0x5   :  { %p120_p2 = pnand %p118_p1, %p115_p0 }
   0x7   :  { %123 = shalt.err (!%p120_p2)
}
   0x8   :  { %s124_s15 = scalar_lea.vmem %s14_s7, 256  ;;  %p129_p4 = scmp.lt.s32.totalorder %s14_s7, %s14_s7 }
   0x9   :  { %p125_p3 = scmp.ne.s32.totalorder %s14_s7, %s124_s15  ;;  %p130_p5 = scmp.lt.s32.totalorder %s124_s15, %s124_s15 }
   0xb   :  { %p131_p6 = por %p130_p5, %p129_p4 }
   0xd   :  { %p132_p7 = pnand %p131_p6, %p125_p3 }
   0xf   :  { %135 = shalt.err (!%p132_p7)
}
  0x10   :  { %s163_s16 = smov 128   ;;  %s164_s17 = smov 8  }
  0x11   :  { %19 = dma.hbm_to_vmem [thread:$0]  %s220_s0, 256, %s14_s7, [#allocation3], %s163_s16, %s163_s16, %s164_s17  }
  0x12   :  { %158 = dma.done.wait [#allocation3], 256  }
  0x13   :  { %159 = vsyncadd [#allocation3], 4294967040  ;;  %v191_v0 = vld [vmem:[#allocation2] sm:$0xff]  ;;  %v193_v1 = vld [vmem:[#allocation2 + $0x8] sm:$0xff]  ;;  %s165_s0 = smov [#allocation5]  }
  0x14   :  { %v25_v2 = vand.u32 2147483647, %v191_v0  ;;  %v26_v3 = vand.u32 2147483647, %v193_v1  ;;  %vm81_vm6 = vcmp.lt.f32.partialorder %v191_v0, 0.0  ;;  %s94_s20 = sshll.u32 %s165_s0, 4  ;;  %s95_s20 = int_to_ptr.vmem [resolvable:$true] %s94_s20 }
  0x15   :  { %vm82_vm7 = vcmp.lt.f32.partialorder %v193_v1, 0.0  ;;  %s136_s21 = scalar_lea.vmem %s95_s20, 256  ;;  %p141_p9 = scmp.lt.s32.totalorder %s95_s20, %s95_s20 }
  0x16   :  { %v29_v4 = vsub.f32 1.0, %v25_v2  ;;  %v33_v5 = vmul.f32 %v25_v2, %v25_v2  ;;  %vm27_vm0 = vcmp.gt.f32.partialorder %v25_v2, 0.5  ;;  %v30_v6 = vsub.f32 1.0, %v26_v3  ;;  %p137_p8 = scmp.ne.s32.totalorder %s95_s20, %s136_s21  ;;  %p142_p10 = scmp.lt.s32.totalorder %s136_s21, %s136_s21 }
  0x17   :  { %v34_v8 = vmul.f32 %v26_v3, %v26_v3  ;;  %vm28_vm1 = vcmp.gt.f32.partialorder %v26_v3, 0.5 }
  0x18   :  { %v31_v7 = vmul.f32 0.5, %v29_v4  ;;  %v32_v9 = vmul.f32 0.5, %v30_v6  ;;  %p143_p11 = por %p142_p10, %p141_p9 }
  0x1a   :  { %v35_v10 = vsel %vm27_vm0, %v31_v7, %v33_v5  ;;  %v36_v12 = vsel %vm28_vm1, %v32_v9, %v34_v8  ;;  %p144_p12 = pnand %p143_p11, %p137_p8 }
  0x1b   :  { %110 = vrsqrt.f32 %v35_v10  ;;  %v53_v11 = vmul.f32 0.0421632, %v35_v10  ;;  %v54_v14 = vmul.f32 0.0421632, %v36_v12  ;;  %vm39_vm2 = vcmp.eq.f32.partialorder %v35_v10, inf }
  0x1c   :  { %112 = vrsqrt.f32 %v36_v12  ;;  %v42_v22 = vand.u32 2147483648, %v35_v10  ;;  %vm41_vm3 = vcmp.eq.f32.partialorder %v35_v10, 0.0  ;;  %vm46_vm4 = vcmp.eq.f32.partialorder %v36_v12, inf }
  0x1d   :  { %v55_v13 = vadd.f32 0.024181312, %v53_v11  ;;  %v56_v16 = vadd.f32 0.024181312, %v54_v14  ;;  %vm48_vm5 = vcmp.eq.f32.partialorder %v36_v12, 0.0  ;;  %v49_v27 = vand.u32 2147483648, %v36_v12 }
  0x1f   :  { %v57_v15 = vmul.f32 %v55_v13, %v35_v10  ;;  %v58_v18 = vmul.f32 %v56_v16, %v36_v12 }
  0x21   :  { %v59_v17 = vadd.f32 0.045470025, %v57_v15  ;;  %v60_v20 = vadd.f32 0.045470025, %v58_v18 }
  0x23   :  { %v61_v19 = vmul.f32 %v59_v17, %v35_v10  ;;  %v62_v25 = vmul.f32 %v60_v20, %v36_v12 }
  0x25   :  { %v111_v21 = vpop.eup %110  ;;  %v63_v24 = vadd.f32 0.074953005, %v61_v19  ;;  %v64_v31 = vadd.f32 0.074953005, %v62_v25 }
  0x26   :  { %v38_v23 = vmul.f32 %v111_v21, %v35_v10  ;;  %v113_v26 = vpop.eup %112 }
  0x27   :  { %v65_v29 = vmul.f32 %v63_v24, %v35_v10  ;;  %v45_v30 = vmul.f32 %v113_v26, %v36_v12  ;;  %v66_v35 = vmul.f32 %v64_v31, %v36_v12 }
  0x28   :  { %v40_v28 = vsel %vm39_vm2, %v35_v10, %v38_v23 }
  0x29   :  { %v43_v32 = vsel %vm41_vm3, %v42_v22, %v40_v28  ;;  %v67_v33 = vadd.f32 0.16666752, %v65_v29  ;;  %v47_v34 = vsel %vm46_vm4, %v36_v12, %v45_v30  ;;  %v68_v39 = vadd.f32 0.16666752, %v66_v35 }
  0x2a   :  { %v51_v36 = vsel %vm27_vm0, %v43_v32, %v25_v2  ;;  %v50_v37 = vsel %vm48_vm5, %v49_v27, %v47_v34 }
  0x2b   :  { %v69_v38 = vmul.f32 %v67_v33, %v35_v10  ;;  %v52_v40 = vsel %vm28_vm1, %v50_v37, %v26_v3  ;;  %v70_v42 = vmul.f32 %v68_v39, %v36_v12 }
  0x2d   :  { %v71_v41 = vmul.f32 %v69_v38, %v51_v36  ;;  %v72_v44 = vmul.f32 %v70_v42, %v52_v40 }
  0x2f   :  { %v73_v43 = vadd.f32 %v71_v41, %v51_v36  ;;  %v74_v46 = vadd.f32 %v72_v44, %v52_v40 }
  0x31   :  { %v75_v45 = vadd.f32 %v73_v43, %v73_v43  ;;  %v76_v48 = vadd.f32 %v74_v46, %v74_v46 }
  0x33   :  { %v77_v47 = vsub.f32 1.5707964, %v75_v45  ;;  %v78_v50 = vsub.f32 1.5707964, %v76_v48 }
  0x35   :  { %v79_v49 = vsel %vm27_vm0, %v77_v47, %v73_v43  ;;  %v80_v52 = vsel %vm28_vm1, %v78_v50, %v74_v46 }
  0x36   :  { %v83_v51 = vsub.f32 0.0, %v79_v49  ;;  %v84_v54 = vsub.f32 0.0, %v80_v52 }
  0x38   :  { %v85_v53 = vsel %vm81_vm6, %v83_v51, %v79_v49  ;;  %v86_v55 = vsel %vm82_vm7, %v84_v54, %v80_v52 }
  0x39   :  { %87 = vst [vmem:[#allocation5] sm:$0xff] %v85_v53  ;;  %88 = vst [vmem:[#allocation5 + $0x8] sm:$0xff] %v86_v55 }
  0x3a   :  { %147 = shalt.err (!%p144_p12)
}
  0x3b   :  { %s148_s24 = scalar_lea.hbm %s221_s1, 256 }
  0x3c   :  { %p149_p13 = scmp.ne.s32.totalorder %s221_s1, %s148_s24  ;;  %p152_p0 = scmp.lt.u32.totalorder %s148_s24, %s221_s1 }
  0x3e   :  { %p154_p1 = pnand %p152_p0, %p149_p13 }
  0x40   :  { %157 = shalt.err (!%p154_p1)
}
  0x41   :  { %100 = dma.vmem_to_hbm [thread:$0]  %s95_s20, 256, %s221_s1, [#allocation4], %s163_s16, %s163_s16, %s164_s17  }
  0x42   :  { %160 = dma.done.wait [#allocation4], 256  }
  0x43   :  { %161 = vsyncadd [#allocation4], 4294967040 }
  0x44   :  { %104 = vsyncpa [#allocation3], 1 }
  0x45   :  { %105 = vsyncpa [#allocation4], 1 }

</bundles_post_ra>
